<compile_context>
chip_gen: v7x
topology: tpu7x:2x2x1
jax: 0.10.0
libtpu: 0.0.40
codegen_flags: <defaults>
</compile_context>

<pallas_src>
import functools
import math

import jax
import jax.numpy as jnp
from jax.experimental import pallas as pl
from jax.experimental.pallas import tpu as pltpu


# ---------------------------------------------------------------------------
# Small helpers
# ---------------------------------------------------------------------------

def _vmem_limit_bytes():
    """Raise the default scoped-VMEM limit, leaving headroom on v7x (64 MiB)."""
    try:
        cap = pltpu.get_tpu_info().vmem_capacity_bytes
    except Exception:
        cap = 64 * 1024 * 1024
    return min(int(cap * 3 // 4), 100 * 1024 * 1024)


def _pick_tile(n, target):
    """Largest sublane-aligned (multiple of 8) divisor of n that is <= target.

    Falls back to the full extent n (always a legal block shape).
    TODO(synk): pad pathological (non multiple-of-8) row counts instead of
                falling back to the full extent.
    """
    if n <= target:
        return n
    start = target - (target % 8)
    for t in range(start, 7, -8):
        if n % t == 0:
            return t
    return n


def _layernorm(x_f32, g, b, eps=1e-5):
    mean = jnp.mean(x_f32, axis=-1, keepdims=True)
    var = jnp.mean(jnp.square(x_f32 - mean), axis=-1, keepdims=True)
    return (x_f32 - mean) * jax.lax.rsqrt(var + eps) * g.astype(jnp.float32) \
        + b.astype(jnp.float32)


# ---------------------------------------------------------------------------
# Kernel: LayerNorm + linear projection, output split into n D-wide arrays.
# (used for LN1+QKV of self-attention and LN2+Q of cross-attention)
# ---------------------------------------------------------------------------

def _ln_proj_kernel(*refs, n_splits, pos_splits):
    refs = list(refs)
    x_ref = refs.pop(0)
    pos_ref = refs.pop(0) if pos_splits > 0 else None
    g_ref, b_ref, w_ref, bias_ref = refs[:4]
    out_refs = refs[4:]

    x = x_ref[...].astype(jnp.float32)                       # (TR, D)
    y = _layernorm(x, g_ref[0], b_ref[0])
    w = w_ref[...]
    cdt = w.dtype                                            # MXU operand dtype (bf16)
    D = x.shape[-1]
    bias = bias_ref[0].astype(jnp.float32)

    pieces = []
    if pos_splits > 0:                                       # q/k columns see y + pos
        y_pos = (y + pos_ref[...].astype(jnp.float32)).astype(cdt)
        pieces.append(jnp.dot(y_pos, w[:, :pos_splits * D],
                              preferred_element_type=jnp.float32)
                      + bias[:pos_splits * D])
    if pos_splits < n_splits:                                # remaining columns see y
        pieces.append(jnp.dot(y.astype(cdt), w[:, pos_splits * D:],
                              preferred_element_type=jnp.float32)
                      + bias[pos_splits * D:])
    proj = pieces[0] if len(pieces) == 1 else jnp.concatenate(pieces, axis=1)

    for i, oref in enumerate(out_refs):                      # lane-dense (TR, D) stores
        oref[...] = proj[:, i * D:(i + 1) * D].astype(oref.dtype)


def ln_proj(x, pos, g, b, w, bias, *, n_splits, pos_splits, out_dtype,
            row_tile, vmem_limit):
    rows, D = x.shape
    dout = w.shape[1]
    TR = _pick_tile(rows, row_tile)
    grid = (rows // TR,)

    row_spec = pl.BlockSpec((TR, D), lambda i: (i, 0))
    args, specs = [x], [row_spec]
    if pos_splits > 0:
        args.append(pos)
        specs.append(row_spec)
    args += [g.reshape(1, D), b.reshape(1, D), w, bias.reshape(1, dout)]
    specs += [pl.BlockSpec((1, D), lambda i: (0, 0)),
              pl.BlockSpec((1, D), lambda i: (0, 0)),
              pl.BlockSpec((D, dout), lambda i: (0, 0)),
              pl.BlockSpec((1, dout), lambda i: (0, 0))]

    out_shape = tuple(jax.ShapeDtypeStruct((rows, D), out_dtype)
                      for _ in range(n_splits))
    out_specs = tuple(pl.BlockSpec((TR, D), lambda i: (i, 0))
                      for _ in range(n_splits))
    return pl.pallas_call(
        functools.partial(_ln_proj_kernel, n_splits=n_splits, pos_splits=pos_splits),
        out_shape=out_shape,
        grid=grid,
        in_specs=specs,
        out_specs=out_specs,
        compiler_params=pltpu.CompilerParams(
            dimension_semantics=("parallel",), vmem_limit_bytes=vmem_limit),
    )(*args)


# ---------------------------------------------------------------------------
# Kernel: cross-attention K/V projection over memory rows (pos add fused for K).
# ---------------------------------------------------------------------------

def _kv_proj_kernel(*refs, add_pos):
    refs = list(refs)
    mem_ref = refs.pop(0)
    pos_ref = refs.pop(0) if add_pos else None
    wk_ref, bk_ref, wv_ref, bv_ref, k_ref, v_ref = refs

    mem = mem_ref[...].astype(jnp.float32)                   # (TR, D)
    cdt = wk_ref.dtype
    if add_pos:
        k_in = (mem + pos_ref[...].astype(jnp.float32)).astype(cdt)
    else:
        k_in = mem.astype(cdt)
    k = jnp.dot(k_in, wk_ref[...],
                preferred_element_type=jnp.float32) + bk_ref[0].astype(jnp.float32)
    v = jnp.dot(mem.astype(cdt), wv_ref[...],
                preferred_element_type=jnp.float32) + bv_ref[0].astype(jnp.float32)
    k_ref[...] = k.astype(k_ref.dtype)
    v_ref[...] = v.astype(v_ref.dtype)


def kv_proj(mem, pos, wk, bk, wv, bv, *, add_pos, out_dtype, row_tile, vmem_limit):
    rows, D = mem.shape
    TR = _pick_tile(rows, row_tile)
    grid = (rows // TR,)

    row_spec = pl.BlockSpec((TR, D), lambda i: (i, 0))
    mat_spec = pl.BlockSpec((D, D), lambda i: (0, 0))
    vec_spec = pl.BlockSpec((1, D), lambda i: (0, 0))

    args, specs = [mem], [row_spec]
    if add_pos:
        args.append(pos)
        specs.append(row_spec)
    args += [wk, bk.reshape(1, D), wv, bv.reshape(1, D)]
    specs += [mat_spec, vec_spec, mat_spec, vec_spec]

    return pl.pallas_call(
        functools.partial(_kv_proj_kernel, add_pos=add_pos),
        out_shape=(jax.ShapeDtypeStruct((rows, D), out_dtype),
                   jax.ShapeDtypeStruct((rows, D), out_dtype)),
        grid=grid,
        in_specs=specs,
        out_specs=(pl.BlockSpec((TR, D), lambda i: (i, 0)),
                   pl.BlockSpec((TR, D), lambda i: (i, 0))),
        compiler_params=pltpu.CompilerParams(
            dimension_semantics=("parallel",), vmem_limit_bytes=vmem_limit),
    )(*args)


# ---------------------------------------------------------------------------
# Kernel: flash multi-head attention + fused out-projection + residual.
# grid = (B, q-tiles, kv-tiles); kv is the "arbitrary" (reduction) axis.
# q already carries the softmax scale (folded into the projection weights).
# ---------------------------------------------------------------------------

def _attn_kernel(q_ref, k_ref, v_ref, x_ref, wo_ref, bo_ref, out_ref,
                 m_ref, l_ref, acc_ref, *, num_heads):
    kv = pl.program_id(2)

    @pl.when(kv == 0)
    def _():
        m_ref[...] = jnp.full_like(m_ref, -jnp.inf)
        l_ref[...] = jnp.zeros_like(l_ref)
        acc_ref[...] = jnp.zeros_like(acc_ref)

    q = q_ref[0]                                             # (TQ, D) bf16 (pre-scaled)
    k = k_ref[0]                                             # (TK, D) bf16
    v = v_ref[0]                                             # (TK, D) bf16
    D = q.shape[-1]
    hd = D // num_heads

    for h in range(num_heads):
        sl = slice(h * hd, (h + 1) * hd)
        # QK^T on bf16 operands, f32 accumulation.
        s = jax.lax.dot_general(q[:, sl], k[:, sl], (((1,), (1,)), ((), ())),
                                preferred_element_type=jnp.float32)   # (TQ, TK)
        m_prev = m_ref[:, h:h + 1]
        m_new = jnp.maximum(m_prev, jnp.max(s, axis=-1, keepdims=True))
        alpha = jnp.exp(m_prev - m_new)
        p = jnp.exp(s - m_new)
        l_ref[:, h:h + 1] = alpha * l_ref[:, h:h + 1] + jnp.sum(p, axis=-1,
                                                                keepdims=True)
        acc_ref[:, sl] = alpha * acc_ref[:, sl] + jnp.dot(
            p.astype(v.dtype), v[:, sl], preferred_element_type=jnp.float32)
        m_ref[:, h:h + 1] = m_new

    @pl.when(kv == pl.num_programs(2) - 1)
    def _():
        acc = acc_ref[...]
        inv_l = pl.reciprocal(l_ref[...], approx=True)       # (TQ, H), EUP slot
        parts = [acc[:, h * hd:(h + 1) * hd] * inv_l[:, h:h + 1]
                 for h in range(num_heads)]
        o = parts[0] if num_heads == 1 else jnp.concatenate(parts, axis=1)
        # single full-K out-projection on head-packed bf16 output
        proj = jnp.dot(o.astype(wo_ref.dtype), wo_ref[...],
                       preferred_element_type=jnp.float32) \
            + bo_ref[0].astype(jnp.float32)
        out_ref[0] = (x_ref[0].astype(jnp.float32) + proj).astype(out_ref.dtype)


def attention_block(q, k, v, x, wo, bo, *, num_heads, q_tile, kv_tile, vmem_limit):
    B, Nq, D = q.shape
    Nk = k.shape[1]
    assert D % num_heads == 0
    TQ = _pick_tile(Nq, q_tile)
    TK = _pick_tile(Nk, kv_tile)
    grid = (B, Nq // TQ, Nk // TK)

    q_spec = pl.BlockSpec((1, TQ, D), lambda b, qi, ki: (b, qi, 0))
    kv_spec = pl.BlockSpec((1, TK, D), lambda b, qi, ki: (b, ki, 0))
    w_spec = pl.BlockSpec((D, D), lambda b, qi, ki: (0, 0))
    b_spec = pl.BlockSpec((1, D), lambda b, qi, ki: (0, 0))

    return pl.pallas_call(
        functools.partial(_attn_kernel, num_heads=num_heads),
        out_shape=jax.ShapeDtypeStruct((B, Nq, D), x.dtype),
        grid=grid,
        in_specs=[q_spec, kv_spec, kv_spec, q_spec, w_spec, b_spec],
        out_specs=q_spec,
        scratch_shapes=[pltpu.VMEM((TQ, num_heads), jnp.float32),   # m
                        pltpu.VMEM((TQ, num_heads), jnp.float32),   # l
                        pltpu.VMEM((TQ, D), jnp.float32)],          # head-packed acc
        compiler_params=pltpu.CompilerParams(
            dimension_semantics=("parallel", "parallel", "arbitrary"),
            vmem_limit_bytes=vmem_limit),
    )(q, k, v, x, wo, bo.reshape(1, D))


# ---------------------------------------------------------------------------
# Kernel: FFN (LN3 + linear1 + ReLU + linear2 + residual), row-tiled over B*N.
# ---------------------------------------------------------------------------

def _ffn_kernel(x_ref, g_ref, b_ref, w1_ref, b1_ref, w2_ref, b2_ref, out_ref):
    x = x_ref[...].astype(jnp.float32)                       # (TR, D)
    y = _layernorm(x, g_ref[0], b_ref[0])
    w1 = w1_ref[...]
    cdt = w1.dtype
    h = jnp.dot(y.astype(cdt), w1,
                preferred_element_type=jnp.float32) + b1_ref[0].astype(jnp.float32)
    h = jnp.maximum(h, 0.0)                                  # relu
    o = jnp.dot(h.astype(cdt), w2_ref[...],
                preferred_element_type=jnp.float32) + b2_ref[0].astype(jnp.float32)
    out_ref[...] = (x + o).astype(out_ref.dtype)             # fused residual add


def ffn_block(tgt, params, *, row_tile, vmem_limit):
    B, N, D = tgt.shape
    FF = params["w1"].shape[1]
    rows = B * N
    x = tgt.reshape(rows, D)
    TR = _pick_tile(rows, row_tile)
    grid = (rows // TR,)

    out = pl.pallas_call(
        _ffn_kernel,
        out_shape=jax.ShapeDtypeStruct((rows, D), tgt.dtype),
        grid=grid,
        in_specs=[
            pl.BlockSpec((TR, D), lambda i: (i, 0)),
            pl.BlockSpec((1, D), lambda i: (0, 0)),
            pl.BlockSpec((1, D), lambda i: (0, 0)),
            pl.BlockSpec((D, FF), lambda i: (0, 0)),
            pl.BlockSpec((1, FF), lambda i: (0, 0)),
            pl.BlockSpec((FF, D), lambda i: (0, 0)),
            pl.BlockSpec((1, D), lambda i: (0, 0)),
        ],
        out_specs=pl.BlockSpec((TR, D), lambda i: (i, 0)),
        compiler_params=pltpu.CompilerParams(
            dimension_semantics=("parallel",), vmem_limit_bytes=vmem_limit),
    )(x, params["ln3_g"].reshape(1, D), params["ln3_b"].reshape(1, D),
      params["w1"], params["b1"].reshape(1, FF),
      params["w2"], params["b2"].reshape(1, D))
    return out.reshape(B, N, D)


# ---------------------------------------------------------------------------
# Layer forward
# ---------------------------------------------------------------------------

def memory_attention_layer_forward(tgt, memory, pos, query_pos, params, *,
                                   num_heads,
                                   pos_enc_at_attn=False,
                                   pos_enc_at_cross_attn_queries=False,
                                   pos_enc_at_cross_attn_keys=True,
                                   q_tile=256, kv_tile=512,
                                   proj_row_tile=512, ffn_row_tile=512):
    """Forward pass. `params` should come from prepare_params (bf16 weights,
    softmax scale folded into the q projections)."""
    B, Nq, D = tgt.shape
    Nk = memory.shape[1]
    vmem_limit = _vmem_limit_bytes()
    cdt = params["sa_wqkv"].dtype                            # compute (MXU) dtype

    # ---- _forward_sa: norm1 + self_attn + residual (dropout1 = identity) ----
    x2d = tgt.reshape(B * Nq, D)
    qpos2d = query_pos.reshape(B * Nq, D) if pos_enc_at_attn else None
    q, k, v = ln_proj(x2d, qpos2d, params["ln1_g"], params["ln1_b"],
                      params["sa_wqkv"], params["sa_bqkv"],
                      n_splits=3, pos_splits=2 if pos_enc_at_attn else 0,
                      out_dtype=cdt, row_tile=proj_row_tile,
                      vmem_limit=vmem_limit)
    tgt = attention_block(q.reshape(B, Nq, D), k.reshape(B, Nq, D),
                          v.reshape(B, Nq, D), tgt,
                          params["sa_wo"], params["sa_bo"],
                          num_heads=num_heads, q_tile=q_tile, kv_tile=kv_tile,
                          vmem_limit=vmem_limit)

    # ---- _forward_ca: norm2 + cross_attn_image + residual (dropout2 = identity) ----
    x2d = tgt.reshape(B * Nq, D)
    qpos2d = query_pos.reshape(B * Nq, D) if pos_enc_at_cross_attn_queries else None
    q = ln_proj(x2d, qpos2d, params["ln2_g"], params["ln2_b"],
                params["ca_wq"], params["ca_bq"],
                n_splits=1, pos_splits=1 if pos_enc_at_cross_attn_queries else 0,
                out_dtype=cdt, row_tile=proj_row_tile,
                vmem_limit=vmem_limit)[0]
    mem2d = memory.reshape(B * Nk, D)
    pos2d = pos.reshape(B * Nk, D) if pos_enc_at_cross_attn_keys else None
    k, v = kv_proj(mem2d, pos2d, params["ca_wk"], params["ca_bk"],
                   params["ca_wv"], params["ca_bv"],
                   add_pos=pos_enc_at_cross_attn_keys, out_dtype=cdt,
                   row_tile=proj_row_tile, vmem_limit=vmem_limit)
    tgt = attention_block(q.reshape(B, Nq, D), k.reshape(B, Nk, D),
                          v.reshape(B, Nk, D), tgt,
                          params["ca_wo"], params["ca_bo"],
                          num_heads=num_heads, q_tile=q_tile, kv_tile=kv_tile,
                          vmem_limit=vmem_limit)

    # ---- FFN: norm3 + linear2(relu(linear1)) + residual (dropout = identity) ----
    tgt = ffn_block(tgt, params, row_tile=ffn_row_tile, vmem_limit=vmem_limit)
    return tgt


# ---------------------------------------------------------------------------
# Parameter init / prep
# ---------------------------------------------------------------------------

def init_params(key, d_model, dim_feedforward):
    keys = jax.random.split(key, 8)
    ki = iter(keys)

    def w(shape):
        return (0.02 * jax.random.normal(next(ki), shape)).astype(jnp.float32)

    D, FF = d_model, dim_feedforward
    zeros = lambda n: jnp.zeros((n,), jnp.float32)
    ones = lambda n: jnp.ones((n,), jnp.float32)
    return {
        # self-attention: q/k/v projections stored pre-fused as one (D, 3D) weight
        "sa_wqkv": w((D, 3 * D)), "sa_bqkv": zeros(3 * D),
        "sa_wo": w((D, D)), "sa_bo": zeros(D),
        # cross-attention: k sees memory+pos, v sees memory -> kept separate
        "ca_wq": w((D, D)), "ca_bq": zeros(D),
        "ca_wk": w((D, D)), "ca_bk": zeros(D),
        "ca_wv": w((D, D)), "ca_bv": zeros(D),
        "ca_wo": w((D, D)), "ca_bo": zeros(D),
        "ln1_g": ones(D), "ln1_b": zeros(D),
        "ln2_g": ones(D), "ln2_b": zeros(D),
        "ln3_g": ones(D), "ln3_b": zeros(D),
        "w1": w((D, FF)), "b1": zeros(FF),
        "w2": w((FF, D)), "b2": zeros(D),
    }


def prepare_params(params, *, num_heads, compute_dtype=jnp.bfloat16):
    """Fold the softmax scale into the q projections and cast matmul weights to
    the MXU compute dtype (bf16). Biases / LN params stay f32."""
    D = params["sa_wo"].shape[0]
    assert D % num_heads == 0
    scale = 1.0 / math.sqrt(D // num_heads)

    p = dict(params)
    wqkv = jnp.concatenate(
        [params["sa_wqkv"][:, :D] * scale, params["sa_wqkv"][:, D:]], axis=1)
    bqkv = jnp.concatenate(
        [params["sa_bqkv"][:D] * scale, params["sa_bqkv"][D:]], axis=0)
    p["sa_wqkv"] = wqkv.astype(compute_dtype)
    p["sa_bqkv"] = bqkv
    p["ca_wq"] = (params["ca_wq"] * scale).astype(compute_dtype)
    p["ca_bq"] = params["ca_bq"] * scale
    for name in ("sa_wo", "ca_wk", "ca_wv", "ca_wo", "w1", "w2"):
        p[name] = params[name].astype(compute_dtype)
    return p


# ---------------------------------------------------------------------------
# Pure-JAX reference for correctness check (f32 throughout)
# ---------------------------------------------------------------------------

def _ln_ref(x, g, b):
    m = jnp.mean(x, axis=-1, keepdims=True)
    v = jnp.mean((x - m) ** 2, axis=-1, keepdims=True)
    return (x - m) * jax.lax.rsqrt(v + 1e-5) * g + b


def _attn_ref(xq, xk, xv, wq, bq, wk, bk, wv, bv, wo, bo, num_heads):
    q = xq @ wq + bq
    k = xk @ wk + bk
    v = xv @ wv + bv
    B, Nq, D = q.shape
    Nk = k.shape[1]
    hd = D // num_heads
    q = q.reshape(B, Nq, num_heads, hd).transpose(0, 2, 1, 3)
    k = k.reshape(B, Nk, num_heads, hd).transpose(0, 2, 1, 3)
    v = v.reshape(B, Nk, num_heads, hd).transpose(0, 2, 1, 3)
    s = jnp.einsum("bhqd,bhkd->bhqk", q, k) / math.sqrt(hd)
    p = jax.nn.softmax(s, axis=-1)
    o = jnp.einsum("bhqk,bhkd->bhqd", p, v)
    o = o.transpose(0, 2, 1, 3).reshape(B, Nq, D)
    return o @ wo + bo


def reference_forward(tgt, memory, pos, query_pos, params, *, num_heads):
    D = tgt.shape[-1]
    wqkv, bqkv = params["sa_wqkv"], params["sa_bqkv"]
    wq, wk, wv = wqkv[:, :D], wqkv[:, D:2 * D], wqkv[:, 2 * D:]
    bq, bk, bv = bqkv[:D], bqkv[D:2 * D], bqkv[2 * D:]

    # self-attention (pos_enc_at_attn=False)
    tgt2 = _ln_ref(tgt, params["ln1_g"], params["ln1_b"])
    tgt = tgt + _attn_ref(tgt2, tgt2, tgt2, wq, bq, wk, bk, wv, bv,
                          params["sa_wo"], params["sa_bo"], num_heads)
    # cross-attention (pos on keys only)
    tgt2 = _ln_ref(tgt, params["ln2_g"], params["ln2_b"])
    tgt = tgt + _attn_ref(tgt2, memory + pos, memory,
                          params["ca_wq"], params["ca_bq"],
                          params["ca_wk"], params["ca_bk"],
                          params["ca_wv"], params["ca_bv"],
                          params["ca_wo"], params["ca_bo"], num_heads)
    # FFN
    tgt2 = _ln_ref(tgt, params["ln3_g"], params["ln3_b"])
    h = jnp.maximum(tgt2 @ params["w1"] + params["b1"], 0.0)
    return tgt + (h @ params["w2"] + params["b2"])


# ---------------------------------------------------------------------------
# Main
# ---------------------------------------------------------------------------

if __name__ == "__main__":
    B, Nq, Nk = 2, 8, 16
    d_model, dim_feedforward, num_heads = 32, 64, 4

    root = jax.random.PRNGKey(0)
    k_tgt, k_mem, k_pos, k_qpos, k_par = jax.random.split(root, 5)

    tgt = jax.random.normal(k_tgt, (B, Nq, d_model), jnp.float32)
    memory = jax.random.normal(k_mem, (B, Nk, d_model), jnp.float32)
    pos = jax.random.normal(k_pos, (B, Nk, d_model), jnp.float32)
    query_pos = jax.random.normal(k_qpos, (B, Nq, d_model), jnp.float32)

    params = init_params(k_par, d_model, dim_feedforward)
    prepared = prepare_params(params, num_heads=num_heads,
                              compute_dtype=jnp.bfloat16)

    out = memory_attention_layer_forward(
        tgt, memory, pos, query_pos, prepared, num_heads=num_heads)
    out = jax.block_until_ready(out)

    ref = reference_forward(tgt, memory, pos, query_pos, params,
                            num_heads=num_heads)
    ref = jax.block_until_ready(ref)

    assert out.shape == (B, Nq, d_model)
    err = float(jnp.max(jnp.abs(out.astype(jnp.float32) - ref)))
    # tolerance covers bf16 weights/activations on the MXU and the EUP
    # approximate reciprocal in softmax normalization
    assert err < 2e-2, f"max abs err {err}"

    print("KERNEL_OK")
</pallas_src>

<mosaic_0001>
module attributes {stable_mosaic.version = 11 : i64} {
  func.func @_ln_proj_kernel(%arg0: i32, %arg1: memref<16x32xf32, #tpu.memory_space<vmem>>, %arg2: memref<1x32xf32, #tpu.memory_space<vmem>>, %arg3: memref<1x32xf32, #tpu.memory_space<vmem>>, %arg4: memref<32x96xbf16, #tpu.memory_space<vmem>>, %arg5: memref<1x96xf32, #tpu.memory_space<vmem>>, %arg6: memref<16x32xbf16, #tpu.memory_space<vmem>>, %arg7: memref<16x32xbf16, #tpu.memory_space<vmem>>, %arg8: memref<16x32xbf16, #tpu.memory_space<vmem>>) attributes {dimension_semantics = [#tpu.dimension_semantics<parallel>], iteration_bounds = array<i64: 1>, scalar_prefetch = 0 : i64, scratch_operands = 0 : i64, tpu.core_type = #tpu.core_type<tc>, window_params = [{transform_indices = @transform_0, window_bounds = array<i64: 16, 32>}, {pipeline_mode = #tpu.pipeline_mode<synchronous>, transform_indices = @transform_1, window_bounds = array<i64: 1, 32>}, {pipeline_mode = #tpu.pipeline_mode<synchronous>, transform_indices = @transform_2, window_bounds = array<i64: 1, 32>}, {pipeline_mode = #tpu.pipeline_mode<synchronous>, transform_indices = @transform_3, window_bounds = array<i64: 32, 96>}, {pipeline_mode = #tpu.pipeline_mode<synchronous>, transform_indices = @transform_4, window_bounds = array<i64: 1, 96>}, {transform_indices = @transform_5, window_bounds = array<i64: 16, 32>}, {transform_indices = @transform_6, window_bounds = array<i64: 16, 32>}, {transform_indices = @transform_7, window_bounds = array<i64: 16, 32>}]} {
    %c0 = arith.constant 0 : index
    %c0_0 = arith.constant 0 : index
    %0 = vector.load %arg1[%c0, %c0_0] : memref<16x32xf32, #tpu.memory_space<vmem>>, vector<16x32xf32>
    %c0_1 = arith.constant 0 : index
    %c0_2 = arith.constant 0 : index
    %1 = vector.load %arg2[%c0_1, %c0_2] : memref<1x32xf32, #tpu.memory_space<vmem>>, vector<1x32xf32>
    %2 = vector.shape_cast %1 : vector<1x32xf32> to vector<32xf32>
    %c0_3 = arith.constant 0 : index
    %c0_4 = arith.constant 0 : index
    %3 = vector.load %arg3[%c0_3, %c0_4] : memref<1x32xf32, #tpu.memory_space<vmem>>, vector<1x32xf32>
    %4 = vector.shape_cast %3 : vector<1x32xf32> to vector<32xf32>
    %cst = arith.constant dense<0.000000e+00> : vector<16xf32>
    %5 = vector.multi_reduction <add>, %0, %cst [1] : vector<16x32xf32> to vector<16xf32>
    %6 = vector.shape_cast %5 : vector<16xf32> to vector<16x1xf32>
    %cst_5 = arith.constant 3.200000e+01 : f32
    %7 = vector.broadcast %cst_5 : f32 to vector<16x1xf32>
    %8 = arith.divf %6, %7 : vector<16x1xf32>
    %9 = vector.broadcast %8 : vector<16x1xf32> to vector<16x32xf32>
    %10 = arith.subf %0, %9 : vector<16x32xf32>
    %11 = arith.mulf %10, %10 : vector<16x32xf32>
    %cst_6 = arith.constant dense<0.000000e+00> : vector<16xf32>
    %12 = vector.multi_reduction <add>, %11, %cst_6 [1] : vector<16x32xf32> to vector<16xf32>
    %13 = vector.shape_cast %12 : vector<16xf32> to vector<16x1xf32>
    %cst_7 = arith.constant 3.200000e+01 : f32
    %14 = vector.broadcast %cst_7 : f32 to vector<16x1xf32>
    %15 = arith.divf %13, %14 : vector<16x1xf32>
    %16 = vector.broadcast %8 : vector<16x1xf32> to vector<16x32xf32>
    %17 = arith.subf %0, %16 : vector<16x32xf32>
    %cst_8 = arith.constant 9.99999974E-6 : f32
    %18 = vector.broadcast %cst_8 : f32 to vector<16x1xf32>
    %19 = arith.addf %15, %18 : vector<16x1xf32>
    %20 = math.rsqrt %19 : vector<16x1xf32>
    %21 = vector.broadcast %20 : vector<16x1xf32> to vector<16x32xf32>
    %22 = arith.mulf %17, %21 : vector<16x32xf32>
    %23 = vector.shape_cast %2 : vector<32xf32> to vector<1x32xf32>
    %24 = vector.broadcast %23 : vector<1x32xf32> to vector<16x32xf32>
    %25 = arith.mulf %22, %24 : vector<16x32xf32>
    %26 = vector.shape_cast %4 : vector<32xf32> to vector<1x32xf32>
    %27 = vector.broadcast %26 : vector<1x32xf32> to vector<16x32xf32>
    %28 = arith.addf %25, %27 : vector<16x32xf32>
    %c0_9 = arith.constant 0 : index
    %c0_10 = arith.constant 0 : index
    %29 = vector.load %arg4[%c0_9, %c0_10] : memref<32x96xbf16, #tpu.memory_space<vmem>>, vector<32x96xbf16>
    %c0_11 = arith.constant 0 : index
    %c0_12 = arith.constant 0 : index
    %30 = vector.load %arg5[%c0_11, %c0_12] : memref<1x96xf32, #tpu.memory_space<vmem>>, vector<1x96xf32>
    %31 = vector.shape_cast %30 : vector<1x96xf32> to vector<96xf32>
    %32 = arith.truncf %28 : vector<16x32xf32> to vector<16x32xbf16>
    %cst_13 = arith.constant dense<0.000000e+00> : vector<16x96xf32>
    %33 = tpu.matmul %32, %29, %cst_13 {dimension_numbers = #tpu.dot_dimension_numbers<[1], [0], [0], [1], [0, 0, 1, 1], [], []>} : vector<16x32xbf16>, vector<32x96xbf16>, vector<16x96xf32> -> vector<16x96xf32>
    %34 = vector.shape_cast %31 : vector<96xf32> to vector<1x96xf32>
    %35 = vector.broadcast %34 : vector<1x96xf32> to vector<16x96xf32>
    %36 = arith.addf %33, %35 : vector<16x96xf32>
    %37 = vector.extract_strided_slice %36 {offsets = [0, 0], sizes = [16, 32], strides = [1, 1]} : vector<16x96xf32> to vector<16x32xf32>
    %38 = arith.truncf %37 : vector<16x32xf32> to vector<16x32xbf16>
    %c0_14 = arith.constant 0 : index
    %c0_15 = arith.constant 0 : index
    %39 = vector.load %arg6[%c0_14, %c0_15] : memref<16x32xbf16, #tpu.memory_space<vmem>>, vector<16x32xbf16>
    tpu.vector_store %arg6[%c0_14, %c0_15], %38 {strides = array<i32>} : memref<16x32xbf16, #tpu.memory_space<vmem>>, vector<16x32xbf16>,
    %40 = vector.extract_strided_slice %36 {offsets = [0, 32], sizes = [16, 32], strides = [1, 1]} : vector<16x96xf32> to vector<16x32xf32>
    %41 = arith.truncf %40 : vector<16x32xf32> to vector<16x32xbf16>
    %c0_16 = arith.constant 0 : index
    %c0_17 = arith.constant 0 : index
    %42 = vector.load %arg7[%c0_16, %c0_17] : memref<16x32xbf16, #tpu.memory_space<vmem>>, vector<16x32xbf16>
    tpu.vector_store %arg7[%c0_16, %c0_17], %41 {strides = array<i32>} : memref<16x32xbf16, #tpu.memory_space<vmem>>, vector<16x32xbf16>,
    %43 = vector.extract_strided_slice %36 {offsets = [0, 64], sizes = [16, 32], strides = [1, 1]} : vector<16x96xf32> to vector<16x32xf32>
    %44 = arith.truncf %43 : vector<16x32xf32> to vector<16x32xbf16>
    %c0_18 = arith.constant 0 : index
    %c0_19 = arith.constant 0 : index
    %45 = vector.load %arg8[%c0_18, %c0_19] : memref<16x32xbf16, #tpu.memory_space<vmem>>, vector<16x32xbf16>
    tpu.vector_store %arg8[%c0_18, %c0_19], %44 {strides = array<i32>} : memref<16x32xbf16, #tpu.memory_space<vmem>>, vector<16x32xbf16>,
    return
  }
  func.func @transform_0(%arg0: i32) -> (i32, i32) {
    %c0_i32 = arith.constant 0 : i32
    %c0_i32_0 = arith.constant 0 : i32
    return %arg0, %c0_i32 : i32, i32
  }
  func.func @transform_1(%arg0: i32) -> (i32, i32) {
    %c0_i32 = arith.constant 0 : i32
    %c0_i32_0 = arith.constant 0 : i32
    %c0_i32_1 = arith.constant 0 : i32
    return %c0_i32, %c0_i32_0 : i32, i32
  }
  func.func @transform_2(%arg0: i32) -> (i32, i32) {
    %c0_i32 = arith.constant 0 : i32
    %c0_i32_0 = arith.constant 0 : i32
    %c0_i32_1 = arith.constant 0 : i32
    return %c0_i32, %c0_i32_0 : i32, i32
  }
  func.func @transform_3(%arg0: i32) -> (i32, i32) {
    %c0_i32 = arith.constant 0 : i32
    %c0_i32_0 = arith.constant 0 : i32
    %c0_i32_1 = arith.constant 0 : i32
    return %c0_i32, %c0_i32_0 : i32, i32
  }
  func.func @transform_4(%arg0: i32) -> (i32, i32) {
    %c0_i32 = arith.constant 0 : i32
    %c0_i32_0 = arith.constant 0 : i32
    %c0_i32_1 = arith.constant 0 : i32
    return %c0_i32, %c0_i32_0 : i32, i32
  }
  func.func @transform_5(%arg0: i32) -> (i32, i32) {
    %c0_i32 = arith.constant 0 : i32
    %c0_i32_0 = arith.constant 0 : i32
    return %arg0, %c0_i32 : i32, i32
  }
  func.func @transform_6(%arg0: i32) -> (i32, i32) {
    %c0_i32 = arith.constant 0 : i32
    %c0_i32_0 = arith.constant 0 : i32
    return %arg0, %c0_i32 : i32, i32
  }
  func.func @transform_7(%arg0: i32) -> (i32, i32) {
    %c0_i32 = arith.constant 0 : i32
    %c0_i32_0 = arith.constant 0 : i32
    return %arg0, %c0_i32 : i32, i32
  }
}

</mosaic_0001>

<bundles_post_ra>
// kernel: tpu_custom_call.1
= control target key start
LH: loop header
LB: loop body
LE: loop exit
PB: predicated region body
PF: predicated region fallthrough
CT: control target
= control target key end

     0   :  { %13 = vsyncpa [#allocation3], 0  ;;  %s549_s0 = inlined_call_operand.hbm [shape: f32[16,32], index: 0, kind: input, shape index: {}]   ;;  %s550_s1 = inlined_call_operand.vmem [shape: f32[1,32], index: 1, kind: input, shape index: {}]   ;;  %s551_s2 = inlined_call_operand.vmem [shape: f32[1,32], index: 2, kind: input, shape index: {}]   ;;  %s552_s3 = inlined_call_operand.hbm [shape: bf16[32,96], index: 3, kind: input, shape index: {}]   ;;  %s553_s4 = inlined_call_operand.vmem [shape: f32[1,96], index: 4, kind: input, shape index: {}]   ;;  %s554_s5 = inlined_call_operand.hbm [shape: bf16[16,32], index: 5, kind: output, shape index: {0}]   ;;  %s555_s6 = inlined_call_operand.hbm [shape: bf16[16,32], index: 6, kind: output, shape index: {1}]   ;;  %s556_s7 = inlined_call_operand.hbm [shape: bf16[16,32], index: 7, kind: output, shape index: {2}]  }
   0x1   :  { %14 = vsyncpa [#allocation6], 0 }
   0x2   :  { %15 = vsyncpa [#allocation4], 0 }
   0x3   :  { %16 = vsyncpa [#allocation9], 0  ;;  %s403_s24 = smov [#allocation2]   ;;  %s285_s28 = scalar_lea.hbm %s549_s0, 256 }
   0x4   :  { %s22_s25 = sshll.u32 %s403_s24, 4  ;;  %p286_p0 = scmp.ne.s32.totalorder %s549_s0, %s285_s28  ;;  %s23_s25 = int_to_ptr.vmem [resolvable:$true] %s22_s25 }
   0x5   :  { %p289_p1 = scmp.lt.u32.totalorder %s285_s28, %s549_s0 }
   0x7   :  { %p291_p2 = pnand %p289_p1, %p286_p0 }
   0x9   :  { %294 = shalt.err (!%p291_p2)
}
   0xa   :  { %s295_s10 = scalar_lea.vmem %s23_s25, 256  ;;  %p300_p4 = scmp.lt.s32.totalorder %s23_s25, %s23_s25 }
   0xb   :  { %p296_p3 = scmp.ne.s32.totalorder %s23_s25, %s295_s10  ;;  %p301_p5 = scmp.lt.s32.totalorder %s295_s10, %s295_s10 }
   0xd   :  { %p302_p6 = por %p301_p5, %p300_p4 }
   0xf   :  { %p303_p7 = pnand %p302_p6, %p296_p3 }
  0x11   :  { %306 = shalt.err (!%p303_p7)
}
  0x12   :  { %s404_s11 = smov 128   ;;  %s405_s12 = smov 8  }
  0x13   :  { %28 = dma.hbm_to_vmem [thread:$0]  %s549_s0, 256, %s23_s25, [#allocation3], %s404_s11, %s404_s11, %s405_s12  }
  0x14   :  { %s406_s15 = smov [#allocation5]   ;;  %s307_s19 = scalar_lea.hbm %s552_s3, 256 }
  0x15   :  { %s38_s16 = sshll.u32 %s406_s15, 4  ;;  %p308_p8 = scmp.ne.s32.totalorder %s552_s3, %s307_s19  ;;  %s39_s16 = int_to_ptr.vmem [resolvable:$true] %s38_s16 }
  0x16   :  { %p311_p9 = scmp.lt.u32.totalorder %s307_s19, %s552_s3 }
  0x18   :  { %p313_p10 = pnand %p311_p9, %p308_p8 }
  0x1a   :  { %316 = shalt.err (!%p313_p10)
}
  0x1b   :  { %s317_s24 = scalar_lea.vmem %s39_s16, 256  ;;  %p322_p12 = scmp.lt.s32.totalorder %s39_s16, %s39_s16 }
  0x1c   :  { %p318_p11 = scmp.ne.s32.totalorder %s39_s16, %s317_s24  ;;  %p323_p13 = scmp.lt.s32.totalorder %s317_s24, %s317_s24 }
  0x1e   :  { %p324_p0 = por %p323_p13, %p322_p12 }
  0x20   :  { %p325_p1 = pnand %p324_p0, %p318_p11 }
  0x22   :  { %328 = shalt.err (!%p325_p1)
}
  0x23   :  { %s407_s0 = smov 64   ;;  %s408_s25 = smov 4  }
  0x24   :  { %44 = dma.hbm_to_vmem [thread:$0]  %s552_s3, 256, %s39_s16, [#allocation6], %s407_s0, %s407_s0, %s408_s25  }
  0x25   :  { %395 = dma.done.wait [#allocation3], 256  }
  0x26   :  { %396 = vsyncadd [#allocation3], 4294967040 }
  0x27   :  { %397 = dma.done.wait [#allocation6], 256  }
  0x28   :  { %398 = vsyncadd [#allocation6], 4294967040  ;;  %vm58_vm0 = vcmask 261120   ;;  %v54_v0 = vld [vmem:[#allocation2] sm:$0xff]  ;;  %v55_v1 = vld [vmem:[#allocation2 + $0x8] sm:$0xff]  ;;  %v409_v15 = vmov 0.0  }
  0x29   :  { %v59_v2 = vsel %vm58_vm0, %v54_v0, 0.0  ;;  %v62_v3 = vsel %vm58_vm0, %v55_v1, 0.0  ;;  %v279_v14 = vld [vmem:[#allocation5] sm:$0xff]   ;;  %259 = vmatprep.subr.bf16.mxu0 %v409_v15  ;;  %v280_v16 = vld [vmem:[#allocation5 + $0x8] sm:$0xff]   ;;  %vm410_vm1 = vmmov 0   ;;  %vm178_vm2 = vcmask 257024  }
  0x2a   :  { %60 = vadd.xlane.f32.xlu0 %v59_v2  ;;  %260 = vmatpush3.bf16.msra.mxu0 %v279_v14  ;;  %v246_v25 = vld [vmem:[%s550_s1] ss:$0 sm:$0xff]  ;;  %s411_s1 = smov [#allocation7]  }
  0x2b   :  { %263 = vmatprep.mubr.msk.bf16.mxu0 %vm410_vm1, %v409_v15  ;;  %261 = vmatprep.subr.bf16.mxu0 %v409_v15  ;;  %v247_v29 = vld [vmem:[%s551_s2] ss:$0 sm:$0xff]  ;;  %s202_s10 = sshll.u32 %s411_s1, 4  ;;  %s412_s2 = smov 96   ;;  %s203_s10 = int_to_ptr.vmem [resolvable:$true] %s202_s10 }
  0x2c   :  { %v248_v34 = vld [vmem:[%s553_s4] ss:$0 sm:$0xff]  ;;  %s329_s4 = scalar_lea.vmem %s203_s10, 128  ;;  %p334_p3 = scmp.lt.s32.totalorder %s203_s10, %s203_s10 }
  0x2d   :  { %p330_p2 = scmp.ne.s32.totalorder %s203_s10, %s329_s4  ;;  %p335_p4 = scmp.lt.s32.totalorder %s329_s4, %s329_s4 }
  0x2e   :  { %63 = vadd.xlane.f32.xlu0 %v62_v3  ;;  %262 = vmatpush3.bf16.msra.mxu0 %v280_v16 }
  0x2f   :  { %p336_p5 = por %p335_p4, %p334_p3 }
  0x31   :  { %p337_p6 = pnand %p336_p5, %p330_p2 }
  0xb7   :  { %v61_v4 = vpop.xlane.xlu0 %60 }
  0xb8   :  { %v66_v5 = vmul.f32 0.03125, %v61_v4 }
  0xba   :  { %v68_v6 = vsub.f32 %v54_v0, %v66_v5 }
  0xbb   :  { %v64_v7 = vpop.xlane.xlu0 %63 }
  0xbc   :  { %v67_v8 = vmul.f32 0.03125, %v64_v7  ;;  %v70_v9 = vmul.f32 %v68_v6, %v68_v6 }
  0xbe   :  { %v69_v10 = vsub.f32 %v55_v1, %v67_v8  ;;  %v72_v11 = vsel %vm58_vm0, %v70_v9, 0.0 }
  0xbf   :  { %73 = vadd.xlane.f32.xlu1 %v72_v11 }
  0xc0   :  { %v71_v12 = vmul.f32 %v69_v10, %v69_v10 }
  0xc2   :  { %v75_v13 = vsel %vm58_vm0, %v71_v12, 0.0 }
  0xc3   :  { %76 = vadd.xlane.f32.xlu1 %v75_v13 }
 0x14c   :  { %v74_v17 = vpop.xlane.xlu1 %73 }
 0x14d   :  { %v78_v18 = vmul.f32 0.03125, %v74_v17 }
 0x14f   :  { %v80_v19 = vadd.f32 1e-05, %v78_v18 }
 0x150   :  { %v77_v20 = vpop.xlane.xlu1 %76 }
 0x151   :  { %281 = vrsqrt.f32 %v80_v19  ;;  %v79_v21 = vmul.f32 0.03125, %v77_v20 }
 0x153   :  { %v81_v22 = vadd.f32 1e-05, %v79_v21 }
 0x155   :  { %283 = vrsqrt.f32 %v81_v22 }
 0x15b   :  { %v282_v23 = vpop.eup %281 }
 0x15c   :  { %v84_v24 = vmul.f32 %v282_v23, %v68_v6 }
 0x15e   :  { %v92_v28 = vmul.f32 %v246_v25, %v84_v24 }
 0x15f   :  { %v284_v26 = vpop.eup %283 }
 0x160   :  { %v85_v27 = vmul.f32 %v284_v26, %v69_v10  ;;  %v100_v31 = vadd.f32 %v247_v29, %v92_v28 }
 0x162   :  { %v93_v30 = vmul.f32 %v246_v25, %v85_v27 }
 0x164   :  { %v101_v32 = vadd.f32 %v247_v29, %v93_v30 }
 0x166   :  { %v107_v33 = vpack.c.bf16 %v101_v32, %v100_v31 }
 0x168   :  { %264 = vmatmul.mubr.msk.bf16.vlgmr.msra.gmra.mrb[0].mxu0 %vm58_vm0, %v107_v33 }
 0x23b   :  { %v163_v35 = vpop.f32.mrb[0].mxu0 }
 0x23c   :  { %v164_v36 = vadd.f32 %v248_v34, %v163_v35  ;;  %v265_v37 = vpop.f32.mrb[1].mxu0 }
 0x23d   :  { %v166_v38 = vpop.f32.mrb[2].mxu0 }
 0x23e   :  { %v254_v39 = vpack.c.bf16 %v164_v36, %v164_v36  ;;  %v167_v40 = vadd.f32 %v248_v34, %v166_v38  ;;  %v266_v41 = vpop.f32.mrb[3].mxu0 }
 0x240   :  { %v255_v42 = vpack.c.bf16 %v167_v40, %v167_v40  ;;  %189 = vrot.lane.b32.xlu1 %v254_v39, %s407_s0  ;;  %181 = vrot.lane.b32.xlu0 %v254_v39, %s412_s2  ;;  %179 = vst.msk [vmem:[#allocation7] sm:$0xf] %vm178_vm2, %v254_v39 }
 0x242   :  { %180 = vst.msk [vmem:[#allocation7 + $0x4] sm:$0xf] %vm178_vm2, %v255_v42 }
 0x243   :  { %340 = shalt.err (!%p337_p6)
}
 0x244   :  { %s341_s13 = scalar_lea.hbm %s554_s5, 128 }
 0x245   :  { %p342_p7 = scmp.ne.s32.totalorder %s554_s5, %s341_s13  ;;  %p345_p8 = scmp.lt.u32.totalorder %s341_s13, %s554_s5 }
 0x247   :  { %p347_p9 = pnand %p345_p8, %p342_p7 }
 0x249   :  { %350 = shalt.err (!%p347_p9)
}
 0x24a   :  { %208 = dma.vmem_to_hbm [thread:$0]  %s203_s10, 128, %s554_s5, [#allocation4], %s407_s0, %s407_s0, %s408_s25  }
 0x24b   :  { %183 = vrot.lane.b32.xlu1 %v255_v42, %s412_s2  ;;  %s413_s20 = smov [#allocation8]   ;;  %s414_s22 = smov [#allocation10]  }
 0x24c   :  { %s214_s21 = sshll.u32 %s413_s20, 4  ;;  %s226_s23 = sshll.u32 %s414_s22, 4  ;;  %s215_s21 = int_to_ptr.vmem [resolvable:$true] %s214_s21  ;;  %s227_s23 = int_to_ptr.vmem [resolvable:$true] %s226_s23 }
 0x24d   :  { %s351_s24 = scalar_lea.vmem %s215_s21, 128  ;;  %p356_p11 = scmp.lt.s32.totalorder %s215_s21, %s215_s21 }
 0x24e   :  { %p352_p10 = scmp.ne.s32.totalorder %s215_s21, %s351_s24  ;;  %p357_p12 = scmp.lt.s32.totalorder %s351_s24, %s351_s24 }
 0x24f   :  { %191 = vrot.lane.b32.xlu1 %v255_v42, %s407_s0 }
 0x250   :  { %p358_p13 = por %p357_p12, %p356_p11 }
 0x252   :  { %p359_p0 = pnand %p358_p13, %p352_p10 }
 0x2b2   :  { %v190_v43 = vpop.permute.xlu1 %189  ;;  %v182_v44 = vpop.permute.xlu0 %181 }
 0x2b3   :  { %195 = vst.msk [vmem:[#allocation10] sm:$0xf] %vm178_vm2, %v190_v43  ;;  %187 = vst.msk [vmem:[#allocation8] sm:$0xf] %vm178_vm2, %v182_v44 }
 0x2bd   :  { %v184_v45 = vpop.permute.xlu1 %183 }
 0x2be   :  { %188 = vst.msk [vmem:[#allocation8 + $0x4] sm:$0xf] %vm178_vm2, %v184_v45 }
 0x2bf   :  { %362 = shalt.err (!%p359_p0)
}
 0x2c0   :  { %s363_s27 = scalar_lea.hbm %s555_s6, 128 }
 0x2c1   :  { %p364_p1 = scmp.ne.s32.totalorder %s555_s6, %s363_s27  ;;  %p367_p2 = scmp.lt.u32.totalorder %s363_s27, %s555_s6 }
 0x2c3   :  { %p369_p3 = pnand %p367_p2, %p364_p1 }
 0x2c5   :  { %372 = shalt.err (!%p369_p3)
}
 0x2c6   :  { %220 = dma.vmem_to_hbm [thread:$0]  %s215_s21, 128, %s555_s6, [#allocation9], %s407_s0, %s407_s0, %s408_s25   ;;  %v192_v46 = vpop.permute.xlu1 %191 }
 0x2c7   :  { %196 = vst.msk [vmem:[#allocation10 + $0x4] sm:$0xf] %vm178_vm2, %v192_v46  ;;  %s373_s1 = scalar_lea.vmem %s227_s23, 128  ;;  %p378_p5 = scmp.lt.s32.totalorder %s227_s23, %s227_s23 }
 0x2c8   :  { %p374_p4 = scmp.ne.s32.totalorder %s227_s23, %s373_s1  ;;  %p379_p6 = scmp.lt.s32.totalorder %s373_s1, %s373_s1 }
 0x2ca   :  { %p380_p7 = por %p379_p6, %p378_p5 }
 0x2cc   :  { %p381_p8 = pnand %p380_p7, %p374_p4 }
 0x2ce   :  { %384 = shalt.err (!%p381_p8)
}
 0x2cf   :  { %s385_s4 = scalar_lea.hbm %s556_s7, 128 }
 0x2d0   :  { %p386_p9 = scmp.ne.s32.totalorder %s556_s7, %s385_s4  ;;  %p389_p10 = scmp.lt.u32.totalorder %s385_s4, %s556_s7 }
 0x2d2   :  { %p391_p11 = pnand %p389_p10, %p386_p9 }
 0x2d4   :  { %394 = shalt.err (!%p391_p11)
}
 0x2d5   :  { %232 = dma.vmem_to_hbm [thread:$0]  %s227_s23, 128, %s556_s7, [#allocation9], %s407_s0, %s407_s0, %s408_s25  }
 0x2d6   :  { %399 = dma.done.wait [#allocation4], 128  }
 0x2d7   :  { %400 = vsyncadd [#allocation4], 4294967168 }
 0x2d8   :  { %401 = dma.done.wait [#allocation9], 256  }
 0x2d9   :  { %402 = vsyncadd [#allocation9], 4294967040 }
 0x2da   :  { %242 = vsyncpa [#allocation3], 1 }
 0x2db   :  { %243 = vsyncpa [#allocation6], 1 }
 0x2dc   :  { %244 = vsyncpa [#allocation4], 1 }
 0x2dd   :  { %245 = vsyncpa [#allocation9], 1 }

</bundles_post_ra>
